<compile_context>
chip_gen: v6e
topology: v6e:2x2x1
jax: 0.10.0
libtpu: 0.0.40
codegen_flags: <defaults>
</compile_context>

<pallas_src>
import functools

import jax
import jax.numpy as jnp
from jax import lax
from jax.experimental import pallas as pl
from jax.experimental.pallas import tpu as pltpu

EPS = 1e-5  # nn.InstanceNorm2d default eps


# ----------------------------------------------------------- kernel helpers --

def _edge_masks(C, H, W):
    """Boolean (C, H*W) masks marking first/last row and first/last column."""
    HW = H * W
    pos = lax.broadcasted_iota(jnp.int32, (C, HW), 1)
    colmod = (pos & (W - 1)) if (W & (W - 1)) == 0 else (pos % W)
    top = pos < W
    bot = pos >= HW - W
    lft = colmod == 0
    rgt = colmod == W - 1
    return top, bot, lft, rgt


def _conv3x3_in(x, w_flat, b, masks, H, W, *, relu, use_bf16):
    """ReflectionPad2d(1) + Conv3x3 + InstanceNorm2d (+ ReLU) on a (C, H*W) slab.

    The 9 shifted tap images are built with lane rolls + reflect-edge selects
    (no padded-array copies, no strided-slice relayouts), then concatenated
    into an im2col matrix so the conv is a single (Cout, 9*Cin) @ (9*Cin, H*W)
    MXU matmul whose output stays lane-dense on H*W.
    """
    top, bot, lft, rgt = masks

    up = jnp.roll(x, -W, axis=1)   # row i+1 at row i (wrap junk in last row: never selected)
    dn = jnp.roll(x,  W, axis=1)   # row i-1 at row i (wrap junk in row 0:     never selected)
    rows = (
        jnp.where(top, up, dn),    # dh=0: source row reflect(i-1)
        x,                         # dh=1: source row i
        jnp.where(bot, dn, up),    # dh=2: source row reflect(i+1)
    )

    taps = []
    for r in rows:
        le = jnp.roll(r, -1, axis=1)   # col j+1 (row-wrap junk at j=W-1: never selected)
        ri = jnp.roll(r,  1, axis=1)   # col j-1 (row-wrap junk at j=0:   never selected)
        taps.append(jnp.where(lft, le, ri))   # dw=0: col reflect(j-1)
        taps.append(r)                        # dw=1: col j
        taps.append(jnp.where(rgt, ri, le))   # dw=2: col reflect(j+1)

    col = jnp.concatenate(taps, axis=0)       # (9*Cin, H*W) im2col, tap-major

    if use_bf16:
        # v6e/v7x fast path: bf16 MXU operands, f32 accumulation.
        y = jnp.dot(w_flat.astype(jnp.bfloat16), col.astype(jnp.bfloat16),
                    preferred_element_type=jnp.float32)
    else:
        y = jnp.dot(w_flat, col, preferred_element_type=jnp.float32)
    y = y + b                                  # (Cout, 1) bias broadcast over lanes

    # InstanceNorm2d (affine=False), single-pass statistics over the lane axis.
    mean = jnp.mean(y, axis=1, keepdims=True)
    var = jnp.mean(y * y, axis=1, keepdims=True) - mean * mean
    y = (y - mean) * lax.rsqrt(var + EPS)
    if relu:
        y = jnp.maximum(y, 0.0)
    return y


# -------------------------------------------------------------------- kernel --

def _resnet_block_kernel(x_ref, w1_ref, b1_ref, w2_ref, b2_ref, o_ref, *,
                         H, W, use_bf16):
    # One batch element per grid step.  x_ref block: (1, C, H*W), lane-dense.
    C = x_ref.shape[1]
    x = x_ref[0].astype(jnp.float32)                         # (C, H*W)
    masks = _edge_masks(C, H, W)                             # shared by both convs
    h = _conv3x3_in(x, w1_ref[...], b1_ref[...], masks, H, W,
                    relu=True, use_bf16=use_bf16)            # conv1 + IN + ReLU
    h = _conv3x3_in(h, w2_ref[...], b2_ref[...], masks, H, W,
                    relu=False, use_bf16=use_bf16)           # conv2 + IN
    o_ref[0] = (x + h).astype(o_ref.dtype)                   # residual


def _resnet_block_flat(x_flat, w1_flat, b1, w2_flat, b2, H, W, use_bf16):
    N, C, HW = x_flat.shape
    kernel = functools.partial(_resnet_block_kernel, H=H, W=W, use_bf16=use_bf16)
    flops = N * 2 * 2 * (9 * C) * C * HW        # two 3x3 convs
    bytes_io = (2 * x_flat.size + w1_flat.size + w2_flat.size
                + b1.size + b2.size) * 4
    # TODO(synk): for large pix2pixHD channel counts (C >= 512) add an
    #   "arbitrary" grid axis over Cin/Cout tiles (pl.when-initialised VMEM
    #   accumulator) so the (C, 9C) weight blocks stay under v7x's 64 MiB VMEM.
    # TODO(synk): when N == 1, add a parallel grid axis over spatial row tiles
    #   (two-pass instance norm) so both v7x TensorCores get work.
    return pl.pallas_call(
        kernel,
        out_shape=jax.ShapeDtypeStruct((N, C, HW), x_flat.dtype),
        grid=(N,),
        in_specs=[
            pl.BlockSpec((1, C, HW), lambda n: (n, 0, 0)),
            pl.BlockSpec((C, 9 * C), lambda n: (0, 0)),
            pl.BlockSpec((C, 1), lambda n: (0, 0)),
            pl.BlockSpec((C, 9 * C), lambda n: (0, 0)),
            pl.BlockSpec((C, 1), lambda n: (0, 0)),
        ],
        out_specs=pl.BlockSpec((1, C, HW), lambda n: (n, 0, 0)),
        compiler_params=pltpu.CompilerParams(
            dimension_semantics=("parallel",),
            vmem_limit_bytes=32 * 1024 * 1024,
        ),
        cost_estimate=pl.CostEstimate(
            flops=flops, transcendentals=2 * N * C, bytes_accessed=bytes_io),
    )(x_flat, w1_flat, b1, w2_flat, b2)


def resnet_block(x_nchw, w1_oihw, b1, w2_oihw, b2, use_bf16_matmul=False):
    """PyTorch-facing ResnetBlock forward.

    x_nchw: (N, C, H, W); conv weights in PyTorch OIHW layout (C, C, 3, 3).
    Consumes NCHW natively (free reshapes only, no transposes at the boundary).
    """
    N, C, H, W = x_nchw.shape
    x_flat = x_nchw.reshape(N, C, H * W)
    # Flatten weights to (Cout, 9*Cin), tap-major, matching the im2col layout.
    w1_flat = jnp.transpose(w1_oihw, (0, 2, 3, 1)).reshape(C, 9 * C)
    w2_flat = jnp.transpose(w2_oihw, (0, 2, 3, 1)).reshape(C, 9 * C)
    y = _resnet_block_flat(x_flat, w1_flat, b1.reshape(C, 1),
                           w2_flat, b2.reshape(C, 1), H, W, use_bf16_matmul)
    return y.reshape(N, C, H, W)


# ----------------------------------------------------- pure-JAX reference ----

def _ref_forward(x, w1, b1, w2, b2):
    """Direct NCHW transcription of the PyTorch module."""
    def conv(h, w, b):
        hp = jnp.pad(h, ((0, 0), (0, 0), (1, 1), (1, 1)), mode="reflect")
        y = lax.conv_general_dilated(
            hp, w, window_strides=(1, 1), padding="VALID",
            dimension_numbers=("NCHW", "OIHW", "NCHW"),
            precision=lax.Precision.HIGHEST)
        return y + b.reshape(1, -1, 1, 1)

    def inorm(y):
        m = jnp.mean(y, axis=(2, 3), keepdims=True)
        v = jnp.mean(jnp.square(y - m), axis=(2, 3), keepdims=True)
        return (y - m) * lax.rsqrt(v + EPS)

    h = jnp.maximum(inorm(conv(x, w1, b1)), 0.0)
    h = inorm(conv(h, w2, b2))
    return x + h


# ----------------------------------------------------------------------- main

if __name__ == "__main__":
    N, C, H, W = 2, 8, 16, 16          # dim = 8 channels, 16x16 spatial
    key = jax.random.PRNGKey(0)
    kx, kw1, kb1, kw2, kb2 = jax.random.split(key, 5)

    x = jax.random.normal(kx, (N, C, H, W), dtype=jnp.float32)
    # PyTorch-layout synthetic parameters: OIHW weights, (C,) biases.
    w1 = 0.1 * jax.random.normal(kw1, (C, C, 3, 3), dtype=jnp.float32)
    b1 = 0.1 * jax.random.normal(kb1, (C,), dtype=jnp.float32)
    w2 = 0.1 * jax.random.normal(kw2, (C, C, 3, 3), dtype=jnp.float32)
    b2 = 0.1 * jax.random.normal(kb2, (C,), dtype=jnp.float32)

    ref = jax.block_until_ready(_ref_forward(x, w1, b1, w2, b2))

    # Exact (f32 MXU operands) path: tight tolerance.
    out = jax.block_until_ready(resnet_block(x, w1, b1, w2, b2))
    assert out.shape == (N, C, H, W)
    assert jnp.allclose(out, ref, atol=1e-4, rtol=1e-4), (
        f"f32 path max abs err = {jnp.max(jnp.abs(out - ref))}")

    # bf16-operand MXU fast path (v6e/v7x): loose tolerance (bf16 rounding).
    out_bf16 = jax.block_until_ready(
        resnet_block(x, w1, b1, w2, b2, use_bf16_matmul=True))
    assert jnp.allclose(out_bf16, ref, atol=1e-1, rtol=1e-1), (
        f"bf16 path max abs err = {jnp.max(jnp.abs(out_bf16 - ref))}")

    print("KERNEL_OK")
</pallas_src>

<mosaic_0001>
module attributes {stable_mosaic.version = 11 : i64} {
  func.func @_resnet_block_kernel(%arg0: i32, %arg1: memref<1x8x256xf32, #tpu.memory_space<vmem>>, %arg2: memref<8x72xf32, #tpu.memory_space<vmem>>, %arg3: memref<8x1xf32, #tpu.memory_space<vmem>>, %arg4: memref<8x72xf32, #tpu.memory_space<vmem>>, %arg5: memref<8x1xf32, #tpu.memory_space<vmem>>, %arg6: memref<1x8x256xf32, #tpu.memory_space<vmem>>) attributes {dimension_semantics = [#tpu.dimension_semantics<parallel>], iteration_bounds = array<i64: 2>, scalar_prefetch = 0 : i64, scratch_operands = 0 : i64, tpu.core_type = #tpu.core_type<tc>, window_params = [{transform_indices = @transform_0, window_bounds = array<i64: 1, 8, 256>}, {pipeline_mode = #tpu.pipeline_mode<synchronous>, transform_indices = @transform_1, window_bounds = array<i64: 8, 72>}, {pipeline_mode = #tpu.pipeline_mode<synchronous>, transform_indices = @transform_2, window_bounds = array<i64: 8, 1>}, {pipeline_mode = #tpu.pipeline_mode<synchronous>, transform_indices = @transform_3, window_bounds = array<i64: 8, 72>}, {pipeline_mode = #tpu.pipeline_mode<synchronous>, transform_indices = @transform_4, window_bounds = array<i64: 8, 1>}, {transform_indices = @transform_5, window_bounds = array<i64: 1, 8, 256>}]} {
    %c0 = arith.constant 0 : index
    %c0_0 = arith.constant 0 : index
    %c0_1 = arith.constant 0 : index
    %0 = vector.load %arg1[%c0, %c0_0, %c0_1] : memref<1x8x256xf32, #tpu.memory_space<vmem>>, vector<1x8x256xf32>
    %1 = vector.shape_cast %0 : vector<1x8x256xf32> to vector<8x256xf32>
    %2 = tpu.iota {dimensions = array<i32: 1>} : vector<8x256xi32>
    %c15_i32 = arith.constant 15 : i32
    %3 = vector.broadcast %c15_i32 : i32 to vector<8x256xi32>
    %4 = arith.andi %2, %3 : vector<8x256xi32>
    %c16_i32 = arith.constant 16 : i32
    %5 = vector.broadcast %c16_i32 : i32 to vector<8x256xi32>
    %6 = arith.cmpi slt, %2, %5 : vector<8x256xi32>
    %c240_i32 = arith.constant 240 : i32
    %7 = vector.broadcast %c240_i32 : i32 to vector<8x256xi32>
    %8 = arith.cmpi sge, %2, %7 : vector<8x256xi32>
    %c0_i32 = arith.constant 0 : i32
    %9 = vector.broadcast %c0_i32 : i32 to vector<8x256xi32>
    %10 = arith.cmpi eq, %4, %9 : vector<8x256xi32>
    %c15_i32_2 = arith.constant 15 : i32
    %11 = vector.broadcast %c15_i32_2 : i32 to vector<8x256xi32>
    %12 = arith.cmpi eq, %4, %11 : vector<8x256xi32>
    %c0_3 = arith.constant 0 : index
    %c0_4 = arith.constant 0 : index
    %13 = vector.load %arg2[%c0_3, %c0_4] : memref<8x72xf32, #tpu.memory_space<vmem>>, vector<8x72xf32>
    %c0_5 = arith.constant 0 : index
    %c0_6 = arith.constant 0 : index
    %14 = vector.load %arg3[%c0_5, %c0_6] : memref<8x1xf32, #tpu.memory_space<vmem>>, vector<8x1xf32>
    %15 = vector.extract_strided_slice %1 {offsets = [0, 16], sizes = [8, 240], strides = [1, 1]} : vector<8x256xf32> to vector<8x240xf32>
    %16 = vector.extract_strided_slice %1 {offsets = [0, 0], sizes = [8, 16], strides = [1, 1]} : vector<8x256xf32> to vector<8x16xf32>
    %17 = tpu.concatenate %15, %16 in 1 : vector<8x240xf32>, vector<8x16xf32> -> vector<8x256xf32>
    %18 = vector.extract_strided_slice %1 {offsets = [0, 240], sizes = [8, 16], strides = [1, 1]} : vector<8x256xf32> to vector<8x16xf32>
    %19 = vector.extract_strided_slice %1 {offsets = [0, 0], sizes = [8, 240], strides = [1, 1]} : vector<8x256xf32> to vector<8x240xf32>
    %20 = tpu.concatenate %18, %19 in 1 : vector<8x16xf32>, vector<8x240xf32> -> vector<8x256xf32>
    %21 = arith.select %6, %17, %20 : vector<8x256xi1>, vector<8x256xf32>
    %22 = arith.select %8, %20, %17 : vector<8x256xi1>, vector<8x256xf32>
    %23 = vector.extract_strided_slice %21 {offsets = [0, 1], sizes = [8, 255], strides = [1, 1]} : vector<8x256xf32> to vector<8x255xf32>
    %24 = vector.extract_strided_slice %21 {offsets = [0, 0], sizes = [8, 1], strides = [1, 1]} : vector<8x256xf32> to vector<8x1xf32>
    %25 = tpu.concatenate %23, %24 in 1 : vector<8x255xf32>, vector<8x1xf32> -> vector<8x256xf32>
    %26 = vector.extract_strided_slice %21 {offsets = [0, 255], sizes = [8, 1], strides = [1, 1]} : vector<8x256xf32> to vector<8x1xf32>
    %27 = vector.extract_strided_slice %21 {offsets = [0, 0], sizes = [8, 255], strides = [1, 1]} : vector<8x256xf32> to vector<8x255xf32>
    %28 = tpu.concatenate %26, %27 in 1 : vector<8x1xf32>, vector<8x255xf32> -> vector<8x256xf32>
    %29 = arith.select %10, %25, %28 : vector<8x256xi1>, vector<8x256xf32>
    %30 = arith.select %12, %28, %25 : vector<8x256xi1>, vector<8x256xf32>
    %31 = vector.extract_strided_slice %1 {offsets = [0, 1], sizes = [8, 255], strides = [1, 1]} : vector<8x256xf32> to vector<8x255xf32>
    %32 = vector.extract_strided_slice %1 {offsets = [0, 0], sizes = [8, 1], strides = [1, 1]} : vector<8x256xf32> to vector<8x1xf32>
    %33 = tpu.concatenate %31, %32 in 1 : vector<8x255xf32>, vector<8x1xf32> -> vector<8x256xf32>
    %34 = vector.extract_strided_slice %1 {offsets = [0, 255], sizes = [8, 1], strides = [1, 1]} : vector<8x256xf32> to vector<8x1xf32>
    %35 = vector.extract_strided_slice %1 {offsets = [0, 0], sizes = [8, 255], strides = [1, 1]} : vector<8x256xf32> to vector<8x255xf32>
    %36 = tpu.concatenate %34, %35 in 1 : vector<8x1xf32>, vector<8x255xf32> -> vector<8x256xf32>
    %37 = arith.select %10, %33, %36 : vector<8x256xi1>, vector<8x256xf32>
    %38 = arith.select %12, %36, %33 : vector<8x256xi1>, vector<8x256xf32>
    %39 = vector.extract_strided_slice %22 {offsets = [0, 1], sizes = [8, 255], strides = [1, 1]} : vector<8x256xf32> to vector<8x255xf32>
    %40 = vector.extract_strided_slice %22 {offsets = [0, 0], sizes = [8, 1], strides = [1, 1]} : vector<8x256xf32> to vector<8x1xf32>
    %41 = tpu.concatenate %39, %40 in 1 : vector<8x255xf32>, vector<8x1xf32> -> vector<8x256xf32>
    %42 = vector.extract_strided_slice %22 {offsets = [0, 255], sizes = [8, 1], strides = [1, 1]} : vector<8x256xf32> to vector<8x1xf32>
    %43 = vector.extract_strided_slice %22 {offsets = [0, 0], sizes = [8, 255], strides = [1, 1]} : vector<8x256xf32> to vector<8x255xf32>
    %44 = tpu.concatenate %42, %43 in 1 : vector<8x1xf32>, vector<8x255xf32> -> vector<8x256xf32>
    %45 = arith.select %10, %41, %44 : vector<8x256xi1>, vector<8x256xf32>
    %46 = arith.select %12, %44, %41 : vector<8x256xi1>, vector<8x256xf32>
    %47 = tpu.concatenate %29, %21, %30, %37, %1, %38, %45, %22, %46 in 0 : vector<8x256xf32>, vector<8x256xf32>, vector<8x256xf32>, vector<8x256xf32>, vector<8x256xf32>, vector<8x256xf32>, vector<8x256xf32>, vector<8x256xf32>, vector<8x256xf32> -> vector<72x256xf32>
    %cst = arith.constant dense<0.000000e+00> : vector<8x256xf32>
    %48 = tpu.matmul %13, %47, %cst {dimension_numbers = #tpu.dot_dimension_numbers<[1], [0], [0], [1], [0, 0, 1, 1], [], []>} : vector<8x72xf32>, vector<72x256xf32>, vector<8x256xf32> -> vector<8x256xf32>
    %49 = vector.broadcast %14 : vector<8x1xf32> to vector<8x256xf32>
    %50 = arith.addf %48, %49 : vector<8x256xf32>
    %cst_7 = arith.constant dense<0.000000e+00> : vector<8xf32>
    %51 = vector.multi_reduction <add>, %50, %cst_7 [1] : vector<8x256xf32> to vector<8xf32>
    %52 = vector.shape_cast %51 : vector<8xf32> to vector<8x1xf32>
    %cst_8 = arith.constant 2.560000e+02 : f32
    %53 = vector.broadcast %cst_8 : f32 to vector<8x1xf32>
    %54 = arith.divf %52, %53 : vector<8x1xf32>
    %55 = arith.mulf %50, %50 : vector<8x256xf32>
    %cst_9 = arith.constant dense<0.000000e+00> : vector<8xf32>
    %56 = vector.multi_reduction <add>, %55, %cst_9 [1] : vector<8x256xf32> to vector<8xf32>
    %57 = vector.shape_cast %56 : vector<8xf32> to vector<8x1xf32>
    %cst_10 = arith.constant 2.560000e+02 : f32
    %58 = vector.broadcast %cst_10 : f32 to vector<8x1xf32>
    %59 = arith.divf %57, %58 : vector<8x1xf32>
    %60 = arith.mulf %54, %54 : vector<8x1xf32>
    %61 = arith.subf %59, %60 : vector<8x1xf32>
    %62 = vector.broadcast %54 : vector<8x1xf32> to vector<8x256xf32>
    %63 = arith.subf %50, %62 : vector<8x256xf32>
    %cst_11 = arith.constant 9.99999974E-6 : f32
    %64 = vector.broadcast %cst_11 : f32 to vector<8x1xf32>
    %65 = arith.addf %61, %64 : vector<8x1xf32>
    %66 = math.rsqrt %65 : vector<8x1xf32>
    %67 = vector.broadcast %66 : vector<8x1xf32> to vector<8x256xf32>
    %68 = arith.mulf %63, %67 : vector<8x256xf32>
    %cst_12 = arith.constant 0.000000e+00 : f32
    %69 = vector.broadcast %cst_12 : f32 to vector<8x256xf32>
    %70 = arith.maximumf %68, %69 : vector<8x256xf32>
    %c0_13 = arith.constant 0 : index
    %c0_14 = arith.constant 0 : index
    %71 = vector.load %arg4[%c0_13, %c0_14] : memref<8x72xf32, #tpu.memory_space<vmem>>, vector<8x72xf32>
    %c0_15 = arith.constant 0 : index
    %c0_16 = arith.constant 0 : index
    %72 = vector.load %arg5[%c0_15, %c0_16] : memref<8x1xf32, #tpu.memory_space<vmem>>, vector<8x1xf32>
    %73 = vector.extract_strided_slice %70 {offsets = [0, 16], sizes = [8, 240], strides = [1, 1]} : vector<8x256xf32> to vector<8x240xf32>
    %74 = vector.extract_strided_slice %70 {offsets = [0, 0], sizes = [8, 16], strides = [1, 1]} : vector<8x256xf32> to vector<8x16xf32>
    %75 = tpu.concatenate %73, %74 in 1 : vector<8x240xf32>, vector<8x16xf32> -> vector<8x256xf32>
    %76 = vector.extract_strided_slice %70 {offsets = [0, 240], sizes = [8, 16], strides = [1, 1]} : vector<8x256xf32> to vector<8x16xf32>
    %77 = vector.extract_strided_slice %70 {offsets = [0, 0], sizes = [8, 240], strides = [1, 1]} : vector<8x256xf32> to vector<8x240xf32>
    %78 = tpu.concatenate %76, %77 in 1 : vector<8x16xf32>, vector<8x240xf32> -> vector<8x256xf32>
    %79 = arith.select %6, %75, %78 : vector<8x256xi1>, vector<8x256xf32>
    %80 = arith.select %8, %78, %75 : vector<8x256xi1>, vector<8x256xf32>
    %81 = vector.extract_strided_slice %79 {offsets = [0, 1], sizes = [8, 255], strides = [1, 1]} : vector<8x256xf32> to vector<8x255xf32>
    %82 = vector.extract_strided_slice %79 {offsets = [0, 0], sizes = [8, 1], strides = [1, 1]} : vector<8x256xf32> to vector<8x1xf32>
    %83 = tpu.concatenate %81, %82 in 1 : vector<8x255xf32>, vector<8x1xf32> -> vector<8x256xf32>
    %84 = vector.extract_strided_slice %79 {offsets = [0, 255], sizes = [8, 1], strides = [1, 1]} : vector<8x256xf32> to vector<8x1xf32>
    %85 = vector.extract_strided_slice %79 {offsets = [0, 0], sizes = [8, 255], strides = [1, 1]} : vector<8x256xf32> to vector<8x255xf32>
    %86 = tpu.concatenate %84, %85 in 1 : vector<8x1xf32>, vector<8x255xf32> -> vector<8x256xf32>
    %87 = arith.select %10, %83, %86 : vector<8x256xi1>, vector<8x256xf32>
    %88 = arith.select %12, %86, %83 : vector<8x256xi1>, vector<8x256xf32>
    %89 = vector.extract_strided_slice %70 {offsets = [0, 1], sizes = [8, 255], strides = [1, 1]} : vector<8x256xf32> to vector<8x255xf32>
    %90 = vector.extract_strided_slice %70 {offsets = [0, 0], sizes = [8, 1], strides = [1, 1]} : vector<8x256xf32> to vector<8x1xf32>
    %91 = tpu.concatenate %89, %90 in 1 : vector<8x255xf32>, vector<8x1xf32> -> vector<8x256xf32>
    %92 = vector.extract_strided_slice %70 {offsets = [0, 255], sizes = [8, 1], strides = [1, 1]} : vector<8x256xf32> to vector<8x1xf32>
    %93 = vector.extract_strided_slice %70 {offsets = [0, 0], sizes = [8, 255], strides = [1, 1]} : vector<8x256xf32> to vector<8x255xf32>
    %94 = tpu.concatenate %92, %93 in 1 : vector<8x1xf32>, vector<8x255xf32> -> vector<8x256xf32>
    %95 = arith.select %10, %91, %94 : vector<8x256xi1>, vector<8x256xf32>
    %96 = arith.select %12, %94, %91 : vector<8x256xi1>, vector<8x256xf32>
    %97 = vector.extract_strided_slice %80 {offsets = [0, 1], sizes = [8, 255], strides = [1, 1]} : vector<8x256xf32> to vector<8x255xf32>
    %98 = vector.extract_strided_slice %80 {offsets = [0, 0], sizes = [8, 1], strides = [1, 1]} : vector<8x256xf32> to vector<8x1xf32>
    %99 = tpu.concatenate %97, %98 in 1 : vector<8x255xf32>, vector<8x1xf32> -> vector<8x256xf32>
    %100 = vector.extract_strided_slice %80 {offsets = [0, 255], sizes = [8, 1], strides = [1, 1]} : vector<8x256xf32> to vector<8x1xf32>
    %101 = vector.extract_strided_slice %80 {offsets = [0, 0], sizes = [8, 255], strides = [1, 1]} : vector<8x256xf32> to vector<8x255xf32>
    %102 = tpu.concatenate %100, %101 in 1 : vector<8x1xf32>, vector<8x255xf32> -> vector<8x256xf32>
    %103 = arith.select %10, %99, %102 : vector<8x256xi1>, vector<8x256xf32>
    %104 = arith.select %12, %102, %99 : vector<8x256xi1>, vector<8x256xf32>
    %105 = tpu.concatenate %87, %79, %88, %95, %70, %96, %103, %80, %104 in 0 : vector<8x256xf32>, vector<8x256xf32>, vector<8x256xf32>, vector<8x256xf32>, vector<8x256xf32>, vector<8x256xf32>, vector<8x256xf32>, vector<8x256xf32>, vector<8x256xf32> -> vector<72x256xf32>
    %cst_17 = arith.constant dense<0.000000e+00> : vector<8x256xf32>
    %106 = tpu.matmul %71, %105, %cst_17 {dimension_numbers = #tpu.dot_dimension_numbers<[1], [0], [0], [1], [0, 0, 1, 1], [], []>} : vector<8x72xf32>, vector<72x256xf32>, vector<8x256xf32> -> vector<8x256xf32>
    %107 = vector.broadcast %72 : vector<8x1xf32> to vector<8x256xf32>
    %108 = arith.addf %106, %107 : vector<8x256xf32>
    %cst_18 = arith.constant dense<0.000000e+00> : vector<8xf32>
    %109 = vector.multi_reduction <add>, %108, %cst_18 [1] : vector<8x256xf32> to vector<8xf32>
    %110 = vector.shape_cast %109 : vector<8xf32> to vector<8x1xf32>
    %cst_19 = arith.constant 2.560000e+02 : f32
    %111 = vector.broadcast %cst_19 : f32 to vector<8x1xf32>
    %112 = arith.divf %110, %111 : vector<8x1xf32>
    %113 = arith.mulf %108, %108 : vector<8x256xf32>
    %cst_20 = arith.constant dense<0.000000e+00> : vector<8xf32>
    %114 = vector.multi_reduction <add>, %113, %cst_20 [1] : vector<8x256xf32> to vector<8xf32>
    %115 = vector.shape_cast %114 : vector<8xf32> to vector<8x1xf32>
    %cst_21 = arith.constant 2.560000e+02 : f32
    %116 = vector.broadcast %cst_21 : f32 to vector<8x1xf32>
    %117 = arith.divf %115, %116 : vector<8x1xf32>
    %118 = arith.mulf %112, %112 : vector<8x1xf32>
    %119 = arith.subf %117, %118 : vector<8x1xf32>
    %120 = vector.broadcast %112 : vector<8x1xf32> to vector<8x256xf32>
    %121 = arith.subf %108, %120 : vector<8x256xf32>
    %cst_22 = arith.constant 9.99999974E-6 : f32
    %122 = vector.broadcast %cst_22 : f32 to vector<8x1xf32>
    %123 = arith.addf %119, %122 : vector<8x1xf32>
    %124 = math.rsqrt %123 : vector<8x1xf32>
    %125 = vector.broadcast %124 : vector<8x1xf32> to vector<8x256xf32>
    %126 = arith.mulf %121, %125 : vector<8x256xf32>
    %127 = arith.addf %1, %126 : vector<8x256xf32>
    %c0_23 = arith.constant 0 : index
    %c0_24 = arith.constant 0 : index
    %c0_25 = arith.constant 0 : index
    %128 = vector.load %arg6[%c0_23, %c0_24, %c0_25] : memref<1x8x256xf32, #tpu.memory_space<vmem>>, vector<1x8x256xf32>
    %129 = vector.shape_cast %128 : vector<1x8x256xf32> to vector<8x256xf32>
    %130 = vector.shape_cast %127 : vector<8x256xf32> to vector<1x8x256xf32>
    tpu.vector_store %arg6[%c0_23, %c0_24, %c0_25], %130 {strides = array<i32>} : memref<1x8x256xf32, #tpu.memory_space<vmem>>, vector<1x8x256xf32>,
    return
  }
  func.func @transform_0(%arg0: i32) -> (i32, i32, i32) {
    %c0_i32 = arith.constant 0 : i32
    %c0_i32_0 = arith.constant 0 : i32
    %c0_i32_1 = arith.constant 0 : i32
    return %arg0, %c0_i32, %c0_i32_0 : i32, i32, i32
  }
  func.func @transform_1(%arg0: i32) -> (i32, i32) {
    %c0_i32 = arith.constant 0 : i32
    %c0_i32_0 = arith.constant 0 : i32
    %c0_i32_1 = arith.constant 0 : i32
    return %c0_i32, %c0_i32_0 : i32, i32
  }
  func.func @transform_2(%arg0: i32) -> (i32, i32) {
    %c0_i32 = arith.constant 0 : i32
    %c0_i32_0 = arith.constant 0 : i32
    %c0_i32_1 = arith.constant 0 : i32
    return %c0_i32, %c0_i32_0 : i32, i32
  }
  func.func @transform_3(%arg0: i32) -> (i32, i32) {
    %c0_i32 = arith.constant 0 : i32
    %c0_i32_0 = arith.constant 0 : i32
    %c0_i32_1 = arith.constant 0 : i32
    return %c0_i32, %c0_i32_0 : i32, i32
  }
  func.func @transform_4(%arg0: i32) -> (i32, i32) {
    %c0_i32 = arith.constant 0 : i32
    %c0_i32_0 = arith.constant 0 : i32
    %c0_i32_1 = arith.constant 0 : i32
    return %c0_i32, %c0_i32_0 : i32, i32
  }
  func.func @transform_5(%arg0: i32) -> (i32, i32, i32) {
    %c0_i32 = arith.constant 0 : i32
    %c0_i32_0 = arith.constant 0 : i32
    %c0_i32_1 = arith.constant 0 : i32
    return %arg0, %c0_i32, %c0_i32_0 : i32, i32, i32
  }
}

</mosaic_0001>

<bundles_post_ra>
// kernel: tpu_custom_call.1
= control target key start
LH: loop header
LB: loop body
LE: loop exit
PB: predicated region body
PF: predicated region fallthrough
CT: control target
= control target key end

     0   :  { %10 = vsyncpa [#allocation3], 0  ;;  %s1283_s0 = inlined_call_operand.hbm [shape: f32[2,8,256], index: 0, kind: input, shape index: {}]   ;;  %s1284_s1 = inlined_call_operand.vmem [shape: f32[8,72], index: 1, kind: input, shape index: {}]   ;;  %s1285_s2 = inlined_call_operand.vmem [shape: f32[8,1], index: 2, kind: input, shape index: {}]   ;;  %s1286_s3 = inlined_call_operand.vmem [shape: f32[8,72], index: 3, kind: input, shape index: {}]   ;;  %s1287_s4 = inlined_call_operand.vmem [shape: f32[8,1], index: 4, kind: input, shape index: {}]   ;;  %s1288_s5 = inlined_call_operand.hbm [shape: f32[2,8,256], index: 5, kind: output, shape index: {}]  }
   0x1   :  { %12 = vsyncpa [#allocation3 + $0x1], 0 }
   0x2   :  { %13 = vsyncpa [#allocation4], 0 }
   0x3   :  { %15 = vsyncpa [#allocation4 + $0x1], 0  ;;  %s946_s18 = smov 0   ;;  %s948_s19 = smov 0  }
   0x4   :  { %s950_s20 = smov 0   ;;  %s952_s21 = smov 0  }
   0x5 LB: > { %s967_s22 = sadd.s32 4294967295, %s906_s21   ;;  %s739_s23 = sadd.s32 4294967294, %s906_s21   ;;  %s906_s21 = sphi %s952_s21, %s1313_s21   ;;  %s902_s20 = sphi %s950_s20, %s1312_s20   ;;  %s898_s19 = sphi %s948_s19, %s1311_s19   ;;  %s894_s18 = sphi %s946_s18, %s1310_s18  }
   0x6   : > { %s971_s24 = sadd.s32 1, %s906_s21   ;;  %s28_s25 = sadd.s32 1, %s902_s20 }
   0x7   : > { %s25_s26 = ssub.s32 %s906_s21, %s971_s24  ;;  %p35_p0 = scmp.ne.s32.totalorder %s902_s20, %s898_s19 }
   0x8   : > { %p26_p1 = scmp.eq.s32.totalorder %s25_s26, 0  ;;  %p36_p2 = scmp.eq.s32.totalorder %s906_s21, 0 }
   0x9   : > { %p41_p3 = scmp.ne.s32.totalorder %s898_s19, %s894_s18  ;;  %p42_p4 = scmp.eq.s32.totalorder %s967_s22, 0 }
   0xa   : > { %s983_s27 = scalar_select %p26_p1, %s902_s20, %s28_s25  }
   0xb   : > { %p985_p5 = por %p36_p2, %p35_p0  ;;  %p989_p6 = por %p42_p4, %p41_p3 }
   0xc   : > { %p149_p7 = scmp.eq.s32.totalorder %s967_s22, 1  ;;  %p155_p8 = scmp.eq.s32.totalorder %s739_s23, 1 }
   0xd   : > { %s1292_s29 = scalar_select %p989_p6, 1, 0 }
   0xe   : > { %p769_p10 = scmp.lt.s32.totalorder %s906_s21, 2  ;;  %p996_p11 = por %p149_p7, %p35_p0 }
   0xf   : > { %p1000_p12 = por %p155_p8, %p41_p3  ;;  %s187_s7 = sand.u32 1, %s902_s20  }
  0x10   : > { %s1293_s30 = scalar_select %p996_p11, 1, 0 }
  0x11   : > { %s1294_s6 = scalar_select %p1000_p12, 1, 0 }
  0x12   : > { %s755_s8 = sshll.u32 %s906_s21, 8  ;;  %s742_s9 = sshll.u32 %s187_s7, 4 }
  0x13   : > { %s1009_s12 = scalar_lea.hbm %s1283_s0, %s755_s8  ;;  %s191_s13 = scalar_lea.vmem [#allocation2], %s742_s9 }
  0x14   : > { %s199_s14 = sshll.u32 %s191_s13, 4  ;;  %p1013_p13 = pnand %p769_p10, %p985_p5  ;;  %s1017_s14 = int_to_ptr.vmem [resolvable:$true] %s199_s14 }
  0x15   : > { %s188_s16 = scalar_lea.sflag [#allocation3], %s187_s7  ;;  %s814_s17 = scalar_lea.hbm %s1009_s12, 256 }
  0x16   : > { %p815_p2 = scmp.ne.s32.totalorder %s1009_s12, %s814_s17  ;;  %p816_p3 = pneg %p1013_p13 }
  0x17   : > { %s819_s26 = scalar_lea.hbm %s1283_s0, 512  ;;  %p820_p5 = scmp.lt.s32.totalorder %s1009_s12, %s1283_s0 }
  0x18   : > { %p817_p4 = pnand %p816_p3, %p815_p2  ;;  %p821_p8 = scmp.lt.s32.totalorder %s819_s26, %s814_s17 }
  0x1a   : > { %p818_p7 = pneg %p817_p4  ;;  %p822_p10 = por %p821_p8, %p820_p5 }
  0x1c   : > { %p823_p9 = pnand %p822_p10, %p818_p7 }
  0x1e   : > { %826 = shalt.err (!%p823_p9)
}
  0x1f   : > { %s827_s7 = scalar_lea.vmem %s1017_s14, 256  ;;  %s908_s9 = smov [#allocation2]  }
  0x20   : > { %p828_p0 = scmp.ne.s32.totalorder %s1017_s14, %s827_s7  ;;  %s832_s10 = sshll.u32 %s908_s9, 4  ;;  %s833_s10 = int_to_ptr.vmem [resolvable:$false] %s832_s10 }
  0x21   : > { %s834_s11 = scalar_lea.vmem %s833_s10, 512  ;;  %p835_p4 = scmp.lt.s32.totalorder %s1017_s14, %s833_s10 }
  0x22   : > { %p830_p1 = pnand %p828_p0, %p816_p3  ;;  %p836_p12 = scmp.lt.s32.totalorder %s834_s11, %s827_s7 }
  0x24   : > { %p831_p2 = pneg %p830_p1  ;;  %p837_p11 = por %p836_p12, %p835_p4 }
  0x26   : > { %p838_p6 = pnand %p837_p11, %p831_p2 }
  0x28   : > { %841 = shalt.err (!%p838_p6)
}
  0x29   : > { %764 = dma.hbm_to_vmem [thread:$0]  (!%p1013_p13), %s1009_s12, 256, %s1017_s14, %s188_s16  }
  0x2a   : > { %p1296_p9 = scmp.lt.s32.totalorder %s906_s21, 3  ;;  %p1297_p7 = scmp.ge.s32.totalorder %s906_s21, 1 }
  0x2c   : > { %p205_p0 = pnand %p1297_p7, %p1296_p9 }
  0x2d   : > { %s1044_s13 = sand.u32 (!%p205_p0), 1, %s898_s19   ;;  %p1298_p6 = scmp.ne.s32.totalorder (!%p205_p0), %s1292_s29, 0 }
  0x2e   : > { %208 = sbr.rel (%p205_p0) target bundleno = 1311 (0x51f), region = 40  ;;  %s746_s17 = sshll.u32 (!%p205_p0), %s1044_s13, 4 }
  0x2f   : > { %s211_s23 = scalar_lea.sflag (!%p205_p0), [#allocation3], %s1044_s13  ;;  %s214_s15 = scalar_lea.vmem (!%p205_p0), [#allocation2], %s746_s17 }
  0x33   : > { %885 = dma.done.wait (%p1298_p6), %s211_s23, 256  }
  0x34   : > { %887 = vsyncadd (%p1298_p6), %s211_s23, 4294967040  ;;  %v1054_v0 = vld [vmem:[%s214_s15 + $0x8] sm:$0xff]  ;;  %v1056_v1 = vld [vmem:[%s214_s15] sm:$0xff]  ;;  %s909_s12 = smov 16   ;;  %s910_s14 = smov 112   ;;  %v243_v2 = vlaneseq  ;;  %vm264_vm0 = vcmask 916480  }
  0x35   : > { %270 = vrot.lane.b32.xlu1 %v1054_v0, %s909_s12  ;;  %260 = vrot.lane.b32.xlu0 %v1056_v1, %s910_s14  ;;  %s911_s29 = smov 127   ;;  %vm275_vm1 = vcmask 130048   ;;  %s912_s16 = smov 1   ;;  %v913_v14 = vmov 0.0   ;;  %v914_v16 = vmov 0   ;;  %v257_v17 = vld [vmem:[%s1285_s2] sm:$0xff] }
  0x36   : > { %v1070_v3 = vand.u32 127, %v243_v2  ;;  %429 = vmatprep.mubr.f32.mxu0 %v913_v14  ;;  %625 = vmatprep.mubr.f32.mxu1 %v913_v14  ;;  %vm301_vm4 = vcmask 7168   ;;  %vm290_vm7 = vcmask 1039360   ;;  %v256_v59 = vld [vmem:[%s1284_s1] sm:$0xff]  ;;  %vm361_vm10 = vcmask 588800   ;;  %s756_s23 = sshll.u32 %s967_s22, 8 }
  0x37   : > { %809 = vset.pattern.permute.xlu0 %v914_v16  ;;  %s240_s15 = scalar_lea.vmem [#allocation5], %s746_s17  ;;  %s655_s25 = scalar_lea.sflag [#allocation4], %s1044_s13 }
  0x38   : > { %v1073_v6 = vadd.s32 128, %v1070_v3  ;;  %vm248_vm3 = vcmp.lt.s32.totalorder %v1070_v3, 16  ;;  %v246_v21 = vand.u32 15, %v1070_v3  ;;  %p1307_p12 = scmp.ne.s32.totalorder %s1293_s30, 0  ;;  %s915_s22 = smov [#allocation5]  }
  0x39   : > { %273 = vrot.lane.b32.xlu1 %v1056_v1, %s909_s12  ;;  %262 = vrot.lane.b32.xlu0 %v1054_v0, %s910_s14  ;;  %s846_s17 = sshll.u32 %s915_s22, 4  ;;  %s847_s17 = int_to_ptr.vmem [resolvable:$false] %s846_s17 }
  0x3a   : > { %vm251_vm2 = vcmp.ge.s32.totalorder %v1073_v6, 240  ;;  %v247_v20 = vand.u32 15, %v1073_v6  ;;  %vm1115_vm6 = vcmp.eq.s32.totalorder %v246_v21, 15  ;;  %vm1131_vm9 = vcmp.eq.s32.totalorder %v246_v21, 0  ;;  %v458_v6 = vld [vmem:[%s1287_s4] sm:$0xff]  ;;  %s848_s28 = scalar_lea.vmem %s847_s17, 512 }
  0x3c   : > { %vm1111_vm5 = vcmp.eq.s32.totalorder %v247_v20, 15  ;;  %vm1127_vm8 = vcmp.eq.s32.totalorder %v247_v20, 0 }
  0x3d   : > { %312 = vrot.lane.b32.xlu1 %v1054_v0, %s911_s29  ;;  %310 = vrot.lane.b32.xlu0 %v1056_v1, %s911_s29 }
  0xa7   : > { %v271_v4 = vpop.permute.xlu1 %270  ;;  %v261_v5 = vpop.permute.xlu0 %260 }
  0xab   : > { %v274_v7 = vpop.permute.xlu1 %273  ;;  %v263_v8 = vpop.permute.xlu0 %262 }
  0xac   : > { %v265_v9 = vsel %vm264_vm0, %v261_v5, %v263_v8  ;;  %v1077_v10 = vsel %vm275_vm1, %v274_v7, %v271_v4  ;;  %v269_v11 = vsel %vm264_vm0, %v263_v8, %v261_v5  ;;  %v279_v13 = vsel %vm275_vm1, %v271_v4, %v274_v7 }
  0xad   : > { %346 = vrot.lane.b32.xlu1 %v265_v9, %s912_s16  ;;  %334 = vrot.lane.b32.xlu0 %v265_v9, %s911_s29  ;;  %v283_v12 = vsel %vm251_vm2, %v1077_v10, %v269_v11  ;;  %v1096_v15 = vsel %vm248_vm3, %v265_v9, %v279_v13 }
  0xaf   : > { %v313_v18 = vpop.permute.xlu1 %312  ;;  %v311_v19 = vpop.permute.xlu0 %310 }
  0xb0   : > { %v318_v41 = vsel %vm290_vm7, %v313_v18, %v311_v19  ;;  %v314_v43 = vsel %vm290_vm7, %v311_v19, %v313_v18 }
  0xb1   : > { %336 = vrot.lane.b32.xlu1 %v283_v12, %s911_s29  ;;  %343 = vrot.lane.b32.xlu0 %v283_v12, %s912_s16 }
  0xb5   : > { %322 = vrot.lane.b32.xlu1 %v1056_v1, %s912_s16  ;;  %319 = vrot.lane.b32.xlu0 %v1054_v0, %s912_s16 }
  0xb9   : > { %288 = vrot.lane.b32.xlu1 %v1077_v10, %s911_s29  ;;  %286 = vrot.lane.b32.xlu0 %v1096_v15, %s911_s29 }
  0xbd   : > { %299 = vrot.lane.b32.xlu1 %v1096_v15, %s912_s16  ;;  %296 = vrot.lane.b32.xlu0 %v1077_v10, %s912_s16 }
  0xc1   : > { %358 = vperm.xlu0 %809, %v257_v17  }
 0x11f   : > { %v347_v22 = vpop.permute.xlu1 %346  ;;  %v335_v23 = vpop.permute.xlu0 %334 }
 0x123   : > { %v337_v26 = vpop.permute.xlu1 %336  ;;  %v344_v27 = vpop.permute.xlu0 %343 }
 0x124   : > { %v338_v28 = vsel %vm290_vm7, %v335_v23, %v337_v26  ;;  %v342_v29 = vsel %vm290_vm7, %v337_v26, %v335_v23  ;;  %v348_v30 = vsel %vm301_vm4, %v347_v22, %v344_v27  ;;  %v351_v31 = vsel %vm301_vm4, %v344_v27, %v347_v22 }
 0x125   : > { %v355_v32 = vsel %vm1111_vm5, %v348_v30, %v342_v29  ;;  %v354_v33 = vsel %vm1115_vm6, %v351_v31, %v338_v28  ;;  %v353_v40 = vsel %vm1127_vm8, %v342_v29, %v348_v30  ;;  %v352_v42 = vsel %vm1131_vm9, %v338_v28, %v351_v31 }
 0x126   : > { %379 = vmatprep.subr.mxu0 %v355_v32 }
 0x127   : > { %v323_v35 = vpop.permute.xlu1 %322  ;;  %380 = vmatpush1.msra.mxu0 %v354_v33  ;;  %v320_v36 = vpop.permute.xlu0 %319 }
 0x128   : > { %v324_v38 = vsel %vm301_vm4, %v323_v35, %v320_v36  ;;  %381 = vmatprep.subr.mxu0 %v283_v12  ;;  %v327_v39 = vsel %vm301_vm4, %v320_v36, %v323_v35 }
 0x129   : > { %382 = vmatpush1.msra.mxu0 %v265_v9  ;;  %v331_v46 = vsel %vm1111_vm5, %v324_v38, %v318_v41  ;;  %v330_v47 = vsel %vm1115_vm6, %v327_v39, %v314_v43  ;;  %v329_v50 = vsel %vm1127_vm8, %v318_v41, %v324_v38  ;;  %v328_v51 = vsel %vm1131_vm9, %v314_v43, %v327_v39 }
 0x12a   : > { %383 = vmatprep.subr.mxu0 %v353_v40 }
 0x12b   : > { %v289_v44 = vpop.permute.xlu1 %288  ;;  %384 = vmatpush1.msra.mxu0 %v352_v42  ;;  %v287_v45 = vpop.permute.xlu0 %286 }
 0x12c   : > { %385 = vmatprep.subr.mxu0 %v331_v46  ;;  %v291_v52 = vsel %vm290_vm7, %v287_v45, %v289_v44  ;;  %v295_v53 = vsel %vm290_vm7, %v289_v44, %v287_v45 }
 0x12d   : > { %386 = vmatpush1.msra.mxu0 %v330_v47 }
 0x12e   : > { %387 = vmatprep.subr.mxu0 %v1054_v0 }
 0x12f   : > { %v300_v48 = vpop.permute.xlu1 %299  ;;  %388 = vmatpush1.msra.mxu0 %v1056_v1  ;;  %v297_v49 = vpop.permute.xlu0 %296 }
 0x130   : > { %v302_v54 = vsel %vm301_vm4, %v300_v48, %v297_v49  ;;  %v305_v55 = vsel %vm301_vm4, %v297_v49, %v300_v48  ;;  %389 = vmatprep.subr.mxu0 %v329_v50 }
 0x131   : > { %390 = vmatpush1.msra.mxu0 %v328_v51  ;;  %v309_v56 = vsel %vm1111_vm5, %v302_v54, %v295_v53  ;;  %v308_v57 = vsel %vm1115_vm6, %v305_v55, %v291_v52  ;;  %v307_v58 = vsel %vm1127_vm8, %v295_v53, %v302_v54  ;;  %v306_v60 = vsel %vm1131_vm9, %v291_v52, %v305_v55 }
 0x132   : > { %391 = vmatprep.subr.mxu0 %v309_v56 }
 0x133   : > { %392 = vmatpush1.msra.mxu0 %v308_v57 }
 0x134   : > { %393 = vmatprep.subr.mxu0 %v1077_v10 }
 0x135   : > { %394 = vmatpush1.msra.mxu0 %v1096_v15 }
 0x136   : > { %395 = vmatprep.subr.mxu0 %v307_v58 }
 0x137   : > { %396 = vmatpush1.msra.mxu0 %v306_v60 }
 0x138   : > { %748 = vmatmul.mubr.msk.f32.vlgmr.msra.gmra.mxu0 %vm361_vm10, %v256_v59 }
 0x13c   : > { %v359_v61 = vpop.permute.xlu0 %358 }
 0x1f8   : > { %v431_v62 = vpop.f32.mrf.mxu0 }
 0x1f9   : > { %v432_v63 = vadd.f32 %v431_v62, %v359_v61 }
 0x1fa   : > { %v433_v2 = vpop.f32.mrf.mxu0 }
 0x1fb   : > { %v434_v4 = vadd.f32 %v433_v2, %v359_v61  ;;  %v441_v7 = vmul.f32 %v432_v63, %v432_v63 }
 0x1fd   : > { %v436_v5 = vadd.f32 %v434_v4, %v432_v63  ;;  %v442_v8 = vmul.f32 %v434_v4, %v434_v4 }
 0x1ff   : > { %437 = vadd.xlane.f32.xlu1 %v436_v5  ;;  %v443_v9 = vadd.f32 %v442_v8, %v441_v7 }
 0x201   : > { %444 = vadd.xlane.f32.xlu0 %v443_v9 }
 0x288   : > { %v438_v10 = vpop.xlane.xlu1 %437 }
 0x289   : > { %v440_v11 = vmul.f32 0.00390625, %v438_v10 }
 0x28a   : > { %v445_v12 = vpop.xlane.xlu0 %444 }
 0x28b   : > { %v446_v13 = vmul.f32 0.00390625, %v445_v12  ;;  %v447_v14 = vmul.f32 %v440_v11, %v440_v11  ;;  %v449_v17 = vsub.f32 %v432_v63, %v440_v11  ;;  %v450_v18 = vsub.f32 %v434_v4, %v440_v11  ;;  %v457_v12 = vld [vmem:[%s1286_s3] sm:$0xff] }
 0x28d   : > { %v448_v15 = vsub.f32 %v446_v13, %v447_v14 }
 0x28f   : > { %v451_v16 = vadd.f32 1e-05, %v448_v15 }
 0x291   : > { %810 = vrsqrt.f32 %v451_v16 }
 0x29e   : > { %v811_v19 = vpop.eup %810 }
 0x29f   : > { %v454_v20 = vmul.f32 %v811_v19, %v450_v18  ;;  %v453_v21 = vmul.f32 %v811_v19, %v449_v17 }
 0x2a1   : > { %v456_v22 = vmax.f32 %v454_v20, 0.0  ;;  %v455_v23 = vmax.f32 %v453_v21, 0.0 }
 0x2a3   : > { %463 = vrot.lane.b32.xlu0 %v456_v22, %s910_s14  ;;  %461 = vrot.lane.b32.xlu1 %v455_v23, %s910_s14 }
 0x2a7   : > { %507 = vrot.lane.b32.xlu0 %v455_v23, %s911_s29  ;;  %470 = vrot.lane.b32.xlu1 %v456_v22, %s909_s12 }
 0x2ab   : > { %473 = vrot.lane.b32.xlu1 %v455_v23, %s909_s12  ;;  %s669_s12 = sshll.u32 %s240_s15, 4  ;;  %s670_s12 = int_to_ptr.vmem [resolvable:$true] %s669_s12 }
 0x2ac   : > { %s842_s26 = scalar_lea.vmem %s670_s12, 256  ;;  %p849_p3 = scmp.lt.s32.totalorder %s670_s12, %s847_s17 }
 0x2ad   : > { %p843_p11 = scmp.ne.s32.totalorder %s670_s12, %s842_s26  ;;  %p850_p5 = scmp.lt.s32.totalorder %s848_s28, %s842_s26 }
 0x2af   : > { %509 = vrot.lane.b32.xlu1 %v456_v22, %s911_s29  ;;  %p844_p13 = pnand %p843_p11, %p1307_p12  ;;  %p851_p8 = por %p850_p5, %p849_p3 }
 0x2b1   : > { %p845_p1 = pneg %p844_p13 }
 0x2b3   : > { %p852_p10 = pnand %p851_p8, %p845_p1 }
 0x315   : > { %v464_v26 = vpop.permute.xlu0 %463  ;;  %v462_v27 = vpop.permute.xlu1 %461 }
 0x316   : > { %v465_v28 = vsel %vm264_vm0, %v462_v27, %v464_v26  ;;  %v469_v31 = vsel %vm264_vm0, %v464_v26, %v462_v27 }
 0x317   : > { %543 = vrot.lane.b32.xlu1 %v465_v28, %s912_s16  ;;  %531 = vrot.lane.b32.xlu0 %v465_v28, %s911_s29 }
 0x319   : > { %v471_v29 = vpop.permute.xlu1 %470  ;;  %v508_v38 = vpop.permute.xlu0 %507 }
 0x31d   : > { %v474_v30 = vpop.permute.xlu1 %473 }
 0x31e   : > { %v475_v32 = vsel %vm275_vm1, %v474_v30, %v471_v29  ;;  %v478_v35 = vsel %vm275_vm1, %v471_v29, %v474_v30 }
 0x31f   : > { %v482_v33 = vsel %vm251_vm2, %v475_v32, %v469_v31  ;;  %v479_v36 = vsel %vm248_vm3, %v465_v28, %v478_v35 }
 0x320   : > { %540 = vrot.lane.b32.xlu0 %v482_v33, %s912_s16  ;;  %533 = vrot.lane.b32.xlu1 %v482_v33, %s911_s29 }
 0x321   : > { %v510_v39 = vpop.permute.xlu1 %509 }
 0x322   : > { %v515_v54 = vsel %vm290_vm7, %v510_v39, %v508_v38  ;;  %v511_v56 = vsel %vm290_vm7, %v508_v38, %v510_v39 }
 0x324   : > { %516 = vrot.lane.b32.xlu0 %v456_v22, %s912_s16  ;;  %519 = vrot.lane.b32.xlu1 %v455_v23, %s912_s16 }
 0x328   : > { %485 = vrot.lane.b32.xlu0 %v479_v36, %s911_s29  ;;  %487 = vrot.lane.b32.xlu1 %v475_v32, %s911_s29 }
 0x32c   : > { %494 = vrot.lane.b32.xlu0 %v475_v32, %s912_s16  ;;  %497 = vrot.lane.b32.xlu1 %v479_v36, %s912_s16  ;;  %s1246_s16 = scalar_lea.hbm %s1288_s5, %s756_s23 }
 0x330   : > { %555 = vperm.xlu0 %809, %v458_v6  }
 0x389   : > { %v532_v40 = vpop.permute.xlu0 %531  ;;  %v544_v41 = vpop.permute.xlu1 %543 }
 0x392   : > { %v541_v42 = vpop.permute.xlu0 %540  ;;  %v534_v3 = vpop.permute.xlu1 %533 }
 0x393   : > { %v545_v43 = vsel %vm301_vm4, %v544_v41, %v541_v42  ;;  %v548_v44 = vsel %vm301_vm4, %v541_v42, %v544_v41  ;;  %v535_v45 = vsel %vm290_vm7, %v532_v40, %v534_v3  ;;  %v539_v46 = vsel %vm290_vm7, %v534_v3, %v532_v40 }
 0x394   : > { %v552_v47 = vsel %vm1111_vm5, %v545_v43, %v539_v46  ;;  %v551_v48 = vsel %vm1115_vm6, %v548_v44, %v535_v45  ;;  %v550_v53 = vsel %vm1127_vm8, %v539_v46, %v545_v43  ;;  %v549_v55 = vsel %vm1131_vm9, %v535_v45, %v548_v44 }
 0x395   : > { %575 = vmatprep.subr.mxu1 %v552_v47 }
 0x396   : > { %v517_v49 = vpop.permute.xlu0 %516  ;;  %576 = vmatpush1.msra.mxu1 %v551_v48  ;;  %v520_v50 = vpop.permute.xlu1 %519 }
 0x397   : > { %v521_v51 = vsel %vm301_vm4, %v520_v50, %v517_v49  ;;  %577 = vmatprep.subr.mxu1 %v482_v33  ;;  %v524_v52 = vsel %vm301_vm4, %v517_v49, %v520_v50 }
 0x398   : > { %578 = vmatpush1.msra.mxu1 %v465_v28  ;;  %v528_v59 = vsel %vm1111_vm5, %v521_v51, %v515_v54  ;;  %v527_v60 = vsel %vm1115_vm6, %v524_v52, %v511_v56  ;;  %v526_v63 = vsel %vm1127_vm8, %v515_v54, %v521_v51  ;;  %v525_v2 = vsel %vm1131_vm9, %v511_v56, %v524_v52 }
 0x399   : > { %579 = vmatprep.subr.mxu1 %v550_v53 }
 0x39a   : > { %v486_v57 = vpop.permute.xlu0 %485  ;;  %580 = vmatpush1.msra.mxu1 %v549_v55  ;;  %v488_v58 = vpop.permute.xlu1 %487 }
 0x39b   : > { %581 = vmatprep.subr.mxu1 %v528_v59  ;;  %v489_v4 = vsel %vm290_vm7, %v486_v57, %v488_v58  ;;  %v493_v5 = vsel %vm290_vm7, %v488_v58, %v486_v57 }
 0x39c   : > { %582 = vmatpush1.msra.mxu1 %v527_v60 }
 0x39d   : > { %583 = vmatprep.subr.mxu1 %v456_v22 }
 0x39e   : > { %v495_v61 = vpop.permute.xlu0 %494  ;;  %584 = vmatpush1.msra.mxu1 %v455_v23  ;;  %v498_v62 = vpop.permute.xlu1 %497 }
 0x39f   : > { %v499_v7 = vsel %vm301_vm4, %v498_v62, %v495_v61  ;;  %v502_v8 = vsel %vm301_vm4, %v495_v61, %v498_v62  ;;  %585 = vmatprep.subr.mxu1 %v526_v63 }
 0x3a0   : > { %586 = vmatpush1.msra.mxu1 %v525_v2  ;;  %v506_v9 = vsel %vm1111_vm5, %v499_v7, %v493_v5  ;;  %v505_v10 = vsel %vm1115_vm6, %v502_v8, %v489_v4  ;;  %v504_v11 = vsel %vm1127_vm8, %v493_v5, %v499_v7  ;;  %v503_v13 = vsel %vm1131_vm9, %v489_v4, %v502_v8 }
 0x3a1   : > { %587 = vmatprep.subr.mxu1 %v506_v9 }
 0x3a2   : > { %588 = vmatpush1.msra.mxu1 %v505_v10 }
 0x3a3   : > { %589 = vmatprep.subr.mxu1 %v475_v32 }
 0x3a4   : > { %590 = vmatpush1.msra.mxu1 %v479_v36 }
 0x3a5   : > { %591 = vmatprep.subr.mxu1 %v504_v11 }
 0x3a6   : > { %592 = vmatpush1.msra.mxu1 %v503_v13 }
 0x3a7   : > { %749 = vmatmul.mubr.msk.f32.vlgmr.msra.gmra.mxu1 %vm361_vm10, %v457_v12 }
 0x3ab   : > { %v556_v24 = vpop.permute.xlu0 %555 }
 0x467   : > { %v627_v25 = vpop.f32.mrf.mxu1 }
 0x468   : > { %v628_v14 = vadd.f32 %v627_v25, %v556_v24 }
 0x469   : > { %v629_v15 = vpop.f32.mrf.mxu1 }
 0x46a   : > { %v630_v16 = vadd.f32 %v629_v15, %v556_v24  ;;  %v636_v18 = vmul.f32 %v628_v14, %v628_v14 }
 0x46c   : > { %v632_v17 = vadd.f32 %v630_v16, %v628_v14  ;;  %v637_v34 = vmul.f32 %v630_v16, %v630_v16 }
 0x46e   : > { %633 = vadd.xlane.f32.xlu1 %v632_v17  ;;  %v638_v19 = vadd.f32 %v637_v34, %v636_v18 }
 0x470   : > { %639 = vadd.xlane.f32.xlu0 %v638_v19 }
 0x4f7   : > { %v634_v20 = vpop.xlane.xlu1 %633 }
 0x4f8   : > { %v635_v21 = vmul.f32 0.00390625, %v634_v20 }
 0x4f9   : > { %v640_v37 = vpop.xlane.xlu0 %639 }
 0x4fa   : > { %v641_v22 = vmul.f32 0.00390625, %v640_v37  ;;  %v642_v23 = vmul.f32 %v635_v21, %v635_v21  ;;  %v644_v28 = vsub.f32 %v628_v14, %v635_v21  ;;  %v645_v29 = vsub.f32 %v630_v16, %v635_v21 }
 0x4fc   : > { %v643_v26 = vsub.f32 %v641_v22, %v642_v23 }
 0x4fe   : > { %v646_v27 = vadd.f32 1e-05, %v643_v26 }
 0x500   : > { %812 = vrsqrt.f32 %v646_v27 }
 0x50d   : > { %v813_v30 = vpop.eup %812 }
 0x50e   : > { %v648_v31 = vmul.f32 %v813_v30, %v644_v28  ;;  %v649_v32 = vmul.f32 %v813_v30, %v645_v29 }
 0x510   : > { %v650_v33 = vadd.f32 %v648_v31, %v1056_v1  ;;  %v651_v35 = vadd.f32 %v649_v32, %v1054_v0 }
 0x512   : > { %652 = vst [vmem:[%s240_s15] sm:$0xff] %v650_v33  ;;  %653 = vst [vmem:[%s240_s15 + $0x8] sm:$0xff] %v651_v35 }
 0x513   : > { %855 = shalt.err (!%p852_p10)
}
 0x514   : > { %s856_s8 = scalar_lea.hbm %s1246_s16, 256  ;;  %s860_s9 = scalar_lea.hbm %s1288_s5, 512 }
 0x515   : > { %p857_p2 = scmp.ne.s32.totalorder %s1246_s16, %s856_s8  ;;  %p861_p7 = scmp.lt.s32.totalorder %s1246_s16, %s1288_s5 }
 0x516   : > { %p862_p0 = scmp.lt.s32.totalorder %s860_s9, %s856_s8 }
 0x517   : > { %p858_p4 = pnand %p857_p2, %p1307_p12 }
 0x518   : > { %p863_p6 = por %p862_p0, %p861_p7 }
 0x519   : > { %p859_p9 = pneg %p858_p4 }
 0x51b   : > { %p864_p11 = pnand %p863_p6, %p859_p9 }
 0x51d   : > { %867 = shalt.err (!%p864_p11)
}
 0x51e   : > { %759 = dma.vmem_to_hbm [thread:$0]  (%p1307_p12), %s670_s12, 256, %s1246_s16, %s655_s25  }
 0x51f PF: > { %s681_s23 = sand.u32 1, %s894_s18   ;;  %p1308_p13 = scmp.ne.s32.totalorder %s1294_s6, 0 }
 0x520   : > { %p1309_p1 = scmp.ge.s32.totalorder %s906_s21, 2  ;;  %s682_s15 = scalar_lea.sflag [#allocation4], %s681_s23 }
 0x522   : > { %p766_p3 = pnand %p1309_p1, %p1308_p13 }
 0x524   : > { %p767_p5 = pneg %p766_p3 }
 0x526   : > { %889 = dma.done.wait (%p767_p5), %s682_s15, 256  }
 0x527   : > { %891 = vsyncadd (%p767_p5), %s682_s15, 4294967040  ;;  %p18_p8 = scmp.ge.s32.totalorder %s971_s24, 4   ;;  %s1310_s18 = smov %s898_s19 }
 0x528   : > { %s1311_s19 = smov %s902_s20  ;;  %s1312_s20 = smov %s983_s27 }
 0x529   : > { %s1313_s21 = smov %s971_s24  ;;  %20 = sbr.rel (!%p18_p8) target bundleno = 5 (0x5), region = 85 }
 0x52e   :  { %687 = vsyncpa [#allocation3], 1 }
 0x52f   :  { %689 = vsyncpa [#allocation3 + $0x1], 1 }
 0x530   :  { %690 = vsyncpa [#allocation4], 1 }
 0x531   :  { %692 = vsyncpa [#allocation4 + $0x1], 1 }

</bundles_post_ra>
